<compile_context>
chip_gen: v5e
topology: v5e:2x2
jax: 0.10.0
libtpu: 0.0.40
codegen_flags: <defaults>
</compile_context>

<pallas_src>
import functools

import jax
import jax.numpy as jnp
from jax import lax
from jax.experimental import pallas as pl
from jax.experimental.pallas import tpu as pltpu


def _default_vmem_limit():
    try:
        cap = pltpu.get_tpu_info().vmem_capacity_bytes
    except Exception:
        cap = 64 * 1024 * 1024            # conservative (v7x) fallback
    return min(int(cap * 3 // 4), 100 * 1024 * 1024)


_VMEM_LIMIT = _default_vmem_limit()


def _round_up(x, m):
    return (x + m - 1) // m * m


# ----------------------------------------------------------------------------
# Batched matmul: (G, M, K) @ (G, K, N) with fused per-column scale/shift + lrelu.
# bf16 operands, f32 accumulation.  Single-K-step path has no scratch at all.
# ----------------------------------------------------------------------------
def _bmm_kernel_1k(a_ref, b_ref, s_ref, t_ref, o_ref, *, act):
    y = jnp.dot(a_ref[0], b_ref[0], preferred_element_type=jnp.float32)
    y = y * s_ref[0] + t_ref[0]
    if act == "lrelu":
        y = jnp.where(y >= 0, y, 0.01 * y)
    o_ref[0] = y.astype(o_ref.dtype)


def _bmm_kernel(a_ref, b_ref, s_ref, t_ref, o_ref, acc_ref, *, act):
    k = pl.program_id(3)

    @pl.when(k == 0)
    def _():
        acc_ref[...] = jnp.zeros_like(acc_ref)

    acc_ref[...] += jnp.dot(a_ref[0], b_ref[0], preferred_element_type=jnp.float32)

    @pl.when(k == pl.num_programs(3) - 1)
    def _():
        y = acc_ref[...] * s_ref[0] + t_ref[0]
        if act == "lrelu":
            y = jnp.where(y >= 0, y, 0.01 * y)
        o_ref[0] = y.astype(o_ref.dtype)


def _mm_tiles(M, K, N):
    # Full-extent (un-padded) blocks for small dims; large tiles for big dims.
    if M <= 1024:
        bm, Mp = M, M
    else:
        bm, Mp = 512, _round_up(M, 512)
    if K <= 2048:
        bk, Kp = K, K
    else:
        bk, Kp = 512, _round_up(K, 512)
    if N <= 512:
        bn, Np = N, N
    else:
        bn, Np = 256, _round_up(N, 256)
    return bm, bk, bn, Mp, Kp, Np


@functools.partial(jax.jit, static_argnames=("act", "out_dtype"))
def _bmm_pallas(a, b, s, t, act, out_dtype):
    G, M, K = a.shape
    N = b.shape[2]
    bm, bk, bn, Mp, Kp, Np = _mm_tiles(M, K, N)
    if Mp != M or Kp != K:
        a = jnp.pad(a, ((0, 0), (0, Mp - M), (0, Kp - K)))
    if Kp != K or Np != N:
        b = jnp.pad(b, ((0, 0), (0, Kp - K), (0, Np - N)))
    if Np != N:
        s = jnp.pad(s, ((0, 0), (0, 0), (0, Np - N)))
        t = jnp.pad(t, ((0, 0), (0, 0), (0, Np - N)))
    nk = Kp // bk
    if nk == 1:
        out = pl.pallas_call(
            functools.partial(_bmm_kernel_1k, act=act),
            out_shape=jax.ShapeDtypeStruct((G, Mp, Np), out_dtype),
            grid=(G, Mp // bm, Np // bn),
            in_specs=[
                pl.BlockSpec((1, bm, Kp), lambda g, i, j: (g, i, 0)),
                pl.BlockSpec((1, Kp, bn), lambda g, i, j: (g, 0, j)),
                pl.BlockSpec((1, 1, bn), lambda g, i, j: (g, 0, j)),
                pl.BlockSpec((1, 1, bn), lambda g, i, j: (g, 0, j)),
            ],
            out_specs=pl.BlockSpec((1, bm, bn), lambda g, i, j: (g, i, j)),
            compiler_params=pltpu.CompilerParams(
                dimension_semantics=("parallel", "parallel", "parallel"),
                vmem_limit_bytes=_VMEM_LIMIT,
            ),
        )(a, b, s, t)
    else:
        out = pl.pallas_call(
            functools.partial(_bmm_kernel, act=act),
            out_shape=jax.ShapeDtypeStruct((G, Mp, Np), out_dtype),
            grid=(G, Mp // bm, Np // bn, nk),
            in_specs=[
                pl.BlockSpec((1, bm, bk), lambda g, i, j, k: (g, i, k)),
                pl.BlockSpec((1, bk, bn), lambda g, i, j, k: (g, k, j)),
                pl.BlockSpec((1, 1, bn), lambda g, i, j, k: (g, 0, j)),
                pl.BlockSpec((1, 1, bn), lambda g, i, j, k: (g, 0, j)),
            ],
            out_specs=pl.BlockSpec((1, bm, bn), lambda g, i, j, k: (g, i, j)),
            scratch_shapes=[pltpu.VMEM((bm, bn), jnp.float32)],
            compiler_params=pltpu.CompilerParams(
                dimension_semantics=("parallel", "parallel", "parallel", "arbitrary"),
                vmem_limit_bytes=_VMEM_LIMIT,
            ),
        )(a, b, s, t)
    if Mp != M or Np != N:
        out = out[:, :M, :N]
    return out


@functools.partial(jax.jit, static_argnames=("act",))
def _bmm_xla(a, b, scale, shift, act):
    y = jnp.einsum("gmk,gkn->gmn", a, b)
    if scale is not None:
        y = y * scale
    if shift is not None:
        y = y + shift
    if act == "lrelu":
        y = jnp.where(y >= 0, y, 0.01 * y)
    return y


def _use_pallas_mm(M, K, N):
    # Tiny / heavily under-filled matmuls stay in XLA (fused with neighbours, and the
    # MXU would run <1% filled on K=16/N=16 anyway).
    return (M >= 256) and (K >= 64) and (N >= 32)


def bmm_ep(a, b, scale=None, shift=None, act="none", out_dtype=jnp.float32):
    """Batched matmul with optional per-(G, N) scale/shift and activation."""
    G, M, K = a.shape
    N = b.shape[2]
    if not _use_pallas_mm(M, K, N):
        sc = None if scale is None else jnp.asarray(scale, jnp.float32)
        sh = None if shift is None else jnp.asarray(shift, jnp.float32)
        y = _bmm_xla(a.astype(jnp.float32), b.astype(jnp.float32), sc, sh, act=act)
        return y.astype(out_dtype)
    s = (jnp.ones((G, 1, N), jnp.float32) if scale is None
         else jnp.broadcast_to(jnp.asarray(scale, jnp.float32), (G, 1, N)))
    t = (jnp.zeros((G, 1, N), jnp.float32) if shift is None
         else jnp.broadcast_to(jnp.asarray(shift, jnp.float32), (G, 1, N)))
    return _bmm_pallas(a.astype(jnp.bfloat16), b.astype(jnp.bfloat16), s, t,
                       act=act, out_dtype=out_dtype)


def matmul_ep(a, b, scale=None, shift=None, act="none", out_dtype=jnp.float32):
    sc = None if scale is None else jnp.reshape(scale, (1, 1, -1))
    sh = None if shift is None else jnp.reshape(shift, (1, 1, -1))
    return bmm_ep(a[None], b[None], sc, sh, act, out_dtype=out_dtype)[0]


def linear(x, w, b=None, out_dtype=jnp.float32):
    """torch nn.Linear: weight (out, in)."""
    shp = x.shape
    y = matmul_ep(x.reshape(-1, shp[-1]), jnp.transpose(w), shift=b, out_dtype=out_dtype)
    return y.reshape(shp[:-1] + (w.shape[0],))


# ----------------------------------------------------------------------------
# 3x3x3 stride-1 pad-1 conv kernel (no HBM im2col).
# Grid = (batch, output H plane).  Three shifted H-planes are DMA'd per step; the 9
# in-plane taps are concatenated along the channel axis in VMEM so each plane needs
# only 3 MXU dots with contraction depth 9*Cin.  Output written lane-dense (W, D*Cout).
# TODO(synk): process several H planes per grid step (halo via manual DMA) to cut the
#             3x activation read amplification and amortize per-step overhead.
# ----------------------------------------------------------------------------
def _conv3_plane_kernel(x0_ref, x1_ref, x2_ref, w_ref, s_ref, t_ref, o_ref, *, act):
    Wp, Dp, Cin = x0_ref.shape[2], x0_ref.shape[3], x0_ref.shape[4]
    W, D = Wp - 2, Dp - 2
    Cout = w_ref.shape[2]
    planes = (x0_ref[0, 0], x1_ref[0, 0], x2_ref[0, 0])         # each (Wp, Dp, Cin)
    acc = jnp.zeros((W * D, Cout), jnp.float32)
    for di in range(3):
        plane = planes[di]
        cols = [plane[dj:dj + W, dk:dk + D, :].reshape(W * D, Cin)
                for dj in range(3) for dk in range(3)]
        win = jnp.concatenate(cols, axis=-1)                    # (W*D, 9*Cin)
        acc = acc + jnp.dot(win, w_ref[di], preferred_element_type=jnp.float32)
    y = acc * s_ref[...] + t_ref[...]
    if act == "lrelu":
        y = jnp.where(y >= 0, y, 0.01 * y)
    o_ref[0, 0] = y.reshape(W, D * Cout).astype(o_ref.dtype)


@functools.partial(jax.jit, static_argnames=("act", "out_dtype"))
def _conv3x3_pallas(xp, wk, scale, shift, act, out_dtype):
    """xp: (B, H+2, W+2, D+2, Cin) bf16; wk: (3, 9*Cin, Cout) bf16; scale/shift: (1, Cout)
    f32.  Returns (B, H, W, D*Cout)."""
    B, Hp, Wp, Dp, Cin = xp.shape
    H, W, D = Hp - 2, Wp - 2, Dp - 2
    Cout = wk.shape[2]
    # TODO(synk): for v7x megacore, fold W tiles into the grid when B*H < 2.
    out = pl.pallas_call(
        functools.partial(_conv3_plane_kernel, act=act),
        out_shape=jax.ShapeDtypeStruct((B, H, W, D * Cout), out_dtype),
        grid=(B, H),
        in_specs=[
            pl.BlockSpec((1, 1, Wp, Dp, Cin), lambda b, h: (b, h, 0, 0, 0)),
            pl.BlockSpec((1, 1, Wp, Dp, Cin), lambda b, h: (b, h + 1, 0, 0, 0)),
            pl.BlockSpec((1, 1, Wp, Dp, Cin), lambda b, h: (b, h + 2, 0, 0, 0)),
            pl.BlockSpec((3, 9 * Cin, Cout), lambda b, h: (0, 0, 0)),
            pl.BlockSpec((1, Cout), lambda b, h: (0, 0)),
            pl.BlockSpec((1, Cout), lambda b, h: (0, 0)),
        ],
        out_specs=pl.BlockSpec((1, 1, W, D * Cout), lambda b, h: (b, h, 0, 0)),
        compiler_params=pltpu.CompilerParams(
            dimension_semantics=("parallel", "parallel"),
            vmem_limit_bytes=_VMEM_LIMIT,
        ),
    )(xp, xp, xp, wk, scale, shift)
    return out


def conv3x3_cl(x, w, scale=None, shift=None, act="none", out_dtype=jnp.float32):
    """Dense 3x3x3 conv, stride 1, padding 1.  torch weight (Cout, Cin, 3, 3, 3).
    Optional fused per-channel scale/shift (e.g. eval BatchNorm) and leaky-relu."""
    Cout, Cin = w.shape[0], w.shape[1]
    if Cin < 8:
        # pad tiny channel counts so the matmul path has a usable contraction / lane fill
        x = jnp.pad(x, ((0, 0),) * 4 + ((0, 8 - Cin),))
        w = jnp.pad(w, ((0, 0), (0, 8 - Cin), (0, 0), (0, 0), (0, 0)))
        Cin = 8
    B, H, W, D, _ = x.shape
    xp = jnp.pad(x.astype(jnp.bfloat16), ((0, 0), (1, 1), (1, 1), (1, 1), (0, 0)))
    wk = jnp.transpose(w, (2, 3, 4, 1, 0)).reshape(3, 9 * Cin, Cout).astype(jnp.bfloat16)
    s = (jnp.ones((Cout,), jnp.float32) if scale is None else scale
         ).reshape(1, Cout).astype(jnp.float32)
    t = (jnp.zeros((Cout,), jnp.float32) if shift is None else shift
         ).reshape(1, Cout).astype(jnp.float32)
    out = _conv3x3_pallas(xp, wk, s, t, act=act, out_dtype=out_dtype)
    return out.reshape(B, H, W, D, Cout)


# ----------------------------------------------------------------------------
# Channels-last instance / group norm: two spatially-blocked Pallas passes
# (per-channel sum/sumsq reduction, then scale/shift apply with optional lrelu).
# ----------------------------------------------------------------------------
def _stats_block(S):
    if S <= 4096:
        return S, S
    bs = 4096
    return bs, _round_up(S, bs)


def _chan_stats_kernel(x_ref, o_ref, acc_ref):
    j = pl.program_id(1)

    @pl.when(j == 0)
    def _():
        acc_ref[...] = jnp.zeros_like(acc_ref)

    x = x_ref[0].astype(jnp.float32)
    acc_ref[0:1, :] += jnp.sum(x, axis=0, keepdims=True)
    acc_ref[1:2, :] += jnp.sum(x * x, axis=0, keepdims=True)

    @pl.when(j == pl.num_programs(1) - 1)
    def _():
        o_ref[0] = acc_ref[...]


@jax.jit
def _chan_stats(x3):
    B, S, C = x3.shape
    bs, Sp = _stats_block(S)
    if Sp != S:
        x3 = jnp.pad(x3, ((0, 0), (0, Sp - S), (0, 0)))
    return pl.pallas_call(
        _chan_stats_kernel,
        out_shape=jax.ShapeDtypeStruct((B, 2, C), jnp.float32),
        grid=(B, Sp // bs),
        in_specs=[pl.BlockSpec((1, bs, C), lambda b, j: (b, j, 0))],
        out_specs=pl.BlockSpec((1, 2, C), lambda b, j: (b, 0, 0)),
        scratch_shapes=[pltpu.VMEM((2, C), jnp.float32)],
        compiler_params=pltpu.CompilerParams(
            dimension_semantics=("parallel", "arbitrary"),
            vmem_limit_bytes=_VMEM_LIMIT,
        ),
    )(x3)


def _scale_shift_kernel(x_ref, s_ref, t_ref, o_ref, *, act):
    y = x_ref[0].astype(jnp.float32) * s_ref[0] + t_ref[0]
    if act == "lrelu":
        y = jnp.where(y >= 0, y, 0.01 * y)
    o_ref[0] = y.astype(o_ref.dtype)


@functools.partial(jax.jit, static_argnames=("act",))
def _apply_scale_shift(x3, scale, shift, act):
    B, S, C = x3.shape
    bs, Sp = _stats_block(S)
    if Sp != S:
        x3 = jnp.pad(x3, ((0, 0), (0, Sp - S), (0, 0)))
    out = pl.pallas_call(
        functools.partial(_scale_shift_kernel, act=act),
        out_shape=jax.ShapeDtypeStruct((B, Sp, C), jnp.float32),
        grid=(B, Sp // bs),
        in_specs=[pl.BlockSpec((1, bs, C), lambda b, j: (b, j, 0)),
                  pl.BlockSpec((1, 1, C), lambda b, j: (b, 0, 0)),
                  pl.BlockSpec((1, 1, C), lambda b, j: (b, 0, 0))],
        out_specs=pl.BlockSpec((1, bs, C), lambda b, j: (b, j, 0)),
        compiler_params=pltpu.CompilerParams(
            dimension_semantics=("parallel", "parallel"),
            vmem_limit_bytes=_VMEM_LIMIT,
        ),
    )(x3, scale, shift)
    return out[:, :S] if Sp != S else out


def instance_norm_cl(x, act="none", eps=1e-5):
    B, H, W, D, C = x.shape
    S = H * W * D
    x3 = x.reshape(B, S, C)
    st = _chan_stats(x3)                                       # (B, 2, C)
    mean = st[:, 0, :] / S
    var = jnp.maximum(st[:, 1, :] / S - mean * mean, 0.0)
    rstd = lax.rsqrt(var + eps)
    scale = rstd[:, None, :]
    shift = (-mean * rstd)[:, None, :]
    return _apply_scale_shift(x3, scale, shift, act=act).reshape(B, H, W, D, C)


def group_norm_cl(x, groups, w, b, eps=1e-5):
    B, H, W, D, C = x.shape
    S = H * W * D
    cg = C // groups
    x3 = x.reshape(B, S, C)
    st = _chan_stats(x3)                                       # (B, 2, C)
    stg = st.reshape(B, 2, groups, cg).sum(axis=-1)            # (B, 2, G)
    cnt = S * cg
    mean_g = stg[:, 0, :] / cnt
    var_g = jnp.maximum(stg[:, 1, :] / cnt - mean_g * mean_g, 0.0)
    rstd_g = lax.rsqrt(var_g + eps)
    mean_c = jnp.repeat(mean_g, cg, axis=-1)                   # (B, C)
    rstd_c = jnp.repeat(rstd_g, cg, axis=-1)
    scale = (w[None, :] * rstd_c)[:, None, :]
    shift = (b[None, :] - mean_c * w[None, :] * rstd_c)[:, None, :]
    return _apply_scale_shift(x3, scale, shift, act="none").reshape(B, H, W, D, C)


# ----------------------------------------------------------------------------
# Row-blocked LayerNorm
# ----------------------------------------------------------------------------
def _row_block(R, C):
    max_rows = max(8, (8 * 1024 * 1024 // (4 * C)) // 8 * 8)
    br = min(1024, max_rows)
    if R <= br:
        br = _round_up(R, 8)
    return br, _round_up(R, br)


def _ln_kernel(x_ref, w_ref, b_ref, o_ref):
    x = x_ref[...]
    mu = jnp.mean(x, axis=-1, keepdims=True)
    xc = x - mu
    var = jnp.mean(xc * xc, axis=-1, keepdims=True)
    o_ref[...] = xc * lax.rsqrt(var + 1e-5) * w_ref[...] + b_ref[...]


@jax.jit
def _layernorm2d(x, w, b):
    x = x.astype(jnp.float32)
    R, C = x.shape
    br, Rp = _row_block(R, C)
    if Rp != R:
        x = jnp.pad(x, ((0, Rp - R), (0, 0)))
    out = pl.pallas_call(
        _ln_kernel,
        out_shape=jax.ShapeDtypeStruct((Rp, C), jnp.float32),
        grid=(Rp // br,),
        in_specs=[pl.BlockSpec((br, C), lambda i: (i, 0)),
                  pl.BlockSpec((1, C), lambda i: (0, 0)),
                  pl.BlockSpec((1, C), lambda i: (0, 0))],
        out_specs=pl.BlockSpec((br, C), lambda i: (i, 0)),
        compiler_params=pltpu.CompilerParams(
            dimension_semantics=("parallel",), vmem_limit_bytes=_VMEM_LIMIT),
    )(x, w.reshape(1, C).astype(jnp.float32), b.reshape(1, C).astype(jnp.float32))
    return out[:R] if Rp != R else out


def layer_norm_last(x, w, b):
    shp = x.shape
    return _layernorm2d(x.reshape(-1, shp[-1]), w, b).reshape(shp)


# ----------------------------------------------------------------------------
# Fused spatial-attention kernel: softmax(q @ k * temp) @ v in one pass.
# ----------------------------------------------------------------------------
def _sa_kernel(q_ref, k_ref, v_ref, tmp_ref, o_ref):
    s = jnp.dot(q_ref[0], k_ref[0], preferred_element_type=jnp.float32)
    s = s * tmp_ref[0]
    m = jnp.max(s, axis=-1, keepdims=True)
    e = jnp.exp(s - m)
    p = e * pl.reciprocal(jnp.sum(e, axis=-1, keepdims=True), approx=True)
    o_ref[0] = jnp.dot(p.astype(v_ref.dtype), v_ref[0],
                       preferred_element_type=jnp.float32).astype(o_ref.dtype)


@jax.jit
def _sa_fused_pallas(q, k, v, temp):
    """q: (G, N, ch), k: (G, ch, proj), v: (G, proj, ch) bf16; temp: (G, 1, 1) f32."""
    G, N, ch = q.shape
    proj = k.shape[2]
    bm = N if N <= 1024 else 1024
    Np = _round_up(N, bm)
    if Np != N:
        q = jnp.pad(q, ((0, 0), (0, Np - N), (0, 0)))
    out = pl.pallas_call(
        _sa_kernel,
        out_shape=jax.ShapeDtypeStruct((G, Np, ch), jnp.float32),
        grid=(G, Np // bm),
        in_specs=[
            pl.BlockSpec((1, bm, ch), lambda g, i: (g, i, 0)),
            pl.BlockSpec((1, ch, proj), lambda g, i: (g, 0, 0)),
            pl.BlockSpec((1, proj, ch), lambda g, i: (g, 0, 0)),
            pl.BlockSpec((1, 1, 1), lambda g, i: (g, 0, 0)),
        ],
        out_specs=pl.BlockSpec((1, bm, ch), lambda g, i: (g, i, 0)),
        compiler_params=pltpu.CompilerParams(
            dimension_semantics=("parallel", "parallel"),
            vmem_limit_bytes=_VMEM_LIMIT,
        ),
    )(q, k, v, temp)
    return out[:, :N] if Np != N else out


def sa_attention(q_t, kp, vp_t, temp2):
    """softmax(q_t @ kp * temp2, axis=-1) @ vp_t"""
    G, N, ch = q_t.shape
    if N < 256:   # tiny score matrices: leave to XLA
        s = jnp.einsum('gnc,gcp->gnp', q_t, kp) * temp2
        p = jax.nn.softmax(s, axis=-1)
        return jnp.einsum('gnp,gpc->gnc', p, vp_t)
    return _sa_fused_pallas(q_t.astype(jnp.bfloat16), kp.astype(jnp.bfloat16),
                            vp_t.astype(jnp.bfloat16), temp2.astype(jnp.float32))


# ----------------------------------------------------------------------------
# Glue ops
# ----------------------------------------------------------------------------
def leaky_relu(x, slope=0.01):
    return jnp.where(x >= 0, x, slope * x)


def l2_normalize(x, eps=1e-12):
    n = jnp.sqrt(jnp.sum(x * x, axis=-1, keepdims=True))
    return x / jnp.maximum(n, eps)


def _bn_scale_shift(p, eps=1e-5):
    # eval-mode BatchNorm3d folded into a per-channel scale/shift
    scale = p['w'] * lax.rsqrt(p['rv'] + eps)
    shift = p['b'] - p['rm'] * scale
    return scale, shift


def conv1x1_cl(x, w, scale=None, shift=None, act="none", out_dtype=jnp.float32):
    shp = x.shape
    Cin = shp[-1]
    Cout = w.shape[0]
    y = matmul_ep(x.reshape(-1, Cin), w.reshape(Cout, Cin).T,
                  scale=scale, shift=shift, act=act, out_dtype=out_dtype)
    return y.reshape(shp[:-1] + (Cout,))


def conv_patchify_cl(x, w, b, k):
    """kernel==stride conv: disjoint patches -> bf16 relayout + Pallas matmul."""
    B, H, W, D, Cin = x.shape
    Cout = w.shape[0]
    Ho, Wo, Do = H // k, W // k, D // k
    xr = x.astype(jnp.bfloat16).reshape(B, Ho, k, Wo, k, Do, k, Cin)
    xr = jnp.transpose(xr, (0, 1, 3, 5, 2, 4, 6, 7)).reshape(B * Ho * Wo * Do, k * k * k * Cin)
    wmat = jnp.transpose(w, (2, 3, 4, 1, 0)).reshape(k * k * k * Cin, Cout)
    y = matmul_ep(xr, wmat, shift=b)
    return y.reshape(B, Ho, Wo, Do, Cout)


def conv_transpose3d_cl(x, w, b, k):
    """ConvTranspose3d with kernel==stride, padding 0.  torch weight (Cin,Cout,k,k,k).
    The matmul emits bf16 so the pixel-shuffle relayout runs at half the bandwidth."""
    B, H, W, D, Cin = x.shape
    Cout = w.shape[1]
    wmat = w.reshape(Cin, Cout * k * k * k)
    y = matmul_ep(x.reshape(-1, Cin), wmat, out_dtype=jnp.bfloat16)
    y = y.reshape(B, H, W, D, Cout, k, k, k)
    y = jnp.transpose(y, (0, 1, 5, 2, 6, 3, 7, 4)).reshape(B, H * k, W * k, D * k, Cout)
    y = y.astype(jnp.float32)
    if b is not None:
        y = y + b
    return y


# ----------------------------------------------------------------------------
# Module forwards
# ----------------------------------------------------------------------------
def unet_res_block(p, x):
    norm_name = p['norm_name']
    residual = x
    if norm_name == 'batch':
        s1, t1 = _bn_scale_shift(p['norm1'])
        out = conv3x3_cl(x, p['conv1_w'], scale=s1, shift=t1, act='lrelu',
                         out_dtype=jnp.bfloat16)
        s2, t2 = _bn_scale_shift(p['norm2'])
        out = conv3x3_cl(out, p['conv2_w'], scale=s2, shift=t2, act='none')
        if 'conv3_w' in p:
            s3, t3 = _bn_scale_shift(p['norm3'])
            residual = conv1x1_cl(residual, p['conv3_w'], scale=s3, shift=t3)
    else:  # instance norm: stats depend on the conv output, so no epilogue fusion
        out = conv3x3_cl(x, p['conv1_w'])
        out = instance_norm_cl(out, act='lrelu')
        out = conv3x3_cl(out, p['conv2_w'])
        out = instance_norm_cl(out)
        if 'conv3_w' in p:
            residual = instance_norm_cl(conv1x1_cl(residual, p['conv3_w']))
    return leaky_relu(out + residual)


def _fold_ace_conv_weights(p, heads, hidden):
    """Fold the 1x1 `fc` conv into the grouped dep_conv, expressed as ONE dense
    block-diagonal 3x3x3 conv over the raw qkvv channels (+ a ones-channel that
    carries the fc bias exactly through the zero spatial padding)."""
    ch = hidden // heads
    dep_w = p['dep_w']                                   # (hidden, 16, 3,3,3)
    fc_w = p['fc_w']                                     # (16, 4*heads)
    fc_b = p['fc_b']                                     # (16,)
    fold = jnp.einsum('osxyz,sm->omxyz', dep_w, fc_w)    # (hidden, 4*heads, 3,3,3)
    grp = jnp.arange(hidden) // heads                    # output channel -> group
    mask = (jnp.arange(ch)[None, :] == grp[:, None]).astype(fold.dtype)   # (hidden, ch)
    dense = fold[:, :, None, :, :, :] * mask[:, None, :, None, None, None]
    dense = dense.reshape(hidden, 4 * hidden, 3, 3, 3)   # input channel = m*ch + c
    w_ones = jnp.einsum('osxyz,s->oxyz', dep_w, fc_b)[:, None]            # fc bias taps
    w_dense = jnp.concatenate([dense, w_ones], axis=1)   # (hidden, 4*hidden+1, 3,3,3)
    return w_dense, p['dep_b']


def ace_forward(p, x_cl, heads):
    B, H, W, D, C = x_cl.shape
    N = H * W * D
    ch = C // heads
    x_tok = x_cl.reshape(B, N, C)
    qkvv = linear(x_tok, p['qkvv_w'], None, out_dtype=jnp.bfloat16)     # (B, N, 4C)

    # --- convolution branch (fc + grouped dep_conv folded into one dense conv) ---
    w_dense, b_dense = _fold_ace_conv_weights(p, heads, C)
    ones = jnp.ones((B, N, 1), qkvv.dtype)
    conv_in = jnp.concatenate([qkvv, ones], axis=-1).reshape(B, H, W, D, 4 * C + 1)
    out_conv = conv3x3_cl(conv_in, w_dense, shift=b_dense).reshape(B, N, C)

    # --- attention branch ---
    qkvv5 = jnp.transpose(qkvv.astype(jnp.float32).reshape(B, N, 4, heads, ch),
                          (2, 0, 3, 1, 4))                              # (4,B,heads,N,ch)
    q_s = jnp.swapaxes(qkvv5[0], -2, -1)                                # (B,heads,ch,N)
    k_s = jnp.swapaxes(qkvv5[1], -2, -1)
    v_ca = jnp.swapaxes(qkvv5[2], -2, -1)
    v_sa = jnp.swapaxes(qkvv5[3], -2, -1)

    k_proj = linear(k_s, p['E_w'], p['E_b'])                            # E and F shared
    v_sa_proj = linear(v_sa, p['E_w'], p['E_b'])

    q_n = l2_normalize(q_s)
    k_n = l2_normalize(k_s)

    G = B * heads
    proj = p['E_w'].shape[0]

    # channel attention: tiny (ch x ch) scores -> XLA (temperature fused by XLA)
    attn_ca = jnp.einsum('bhcn,bhdn->bhcd', q_n, k_n) * p['temperature']
    attn_ca = jax.nn.softmax(attn_ca, axis=-1)
    x_ca = jnp.einsum('bhcd,bhdn->bhcn', attn_ca, v_ca)
    x_ca = jnp.transpose(x_ca, (0, 3, 1, 2)).reshape(B, N, C)

    # spatial attention: scores -> softmax -> @V fused in one Pallas kernel
    temp2 = jnp.tile(p['temperature2'].reshape(heads, 1, 1).astype(jnp.float32), (B, 1, 1))
    q_t = jnp.swapaxes(q_n, -2, -1).reshape(G, N, ch)
    kp = k_proj.reshape(G, ch, proj)
    vp_t = jnp.swapaxes(v_sa_proj, -2, -1).reshape(G, proj, ch)
    x_sa = sa_attention(q_t, kp, vp_t, temp2).reshape(B, heads, N, ch)
    x_sa = jnp.transpose(x_sa, (0, 3, 1, 2)).reshape(B, N, C)   # matches torch permute+reshape

    x_sa = linear(x_sa, p['out_proj_w'], p['out_proj_b'])
    x_ca = linear(x_ca, p['out_proj2_w'], p['out_proj2_b'])
    x_attn = jnp.concatenate([x_sa, x_ca], axis=-1)
    return p['rate'] * x_attn + p['rate2'] * out_conv                   # (B, N, C)


def transformer_block(p, x_cl, heads):
    B, H, W, D, C = x_cl.shape
    N = H * W * D
    x_tok = x_cl.reshape(B, N, C) + p['pos_embed']
    xn = layer_norm_last(x_tok, p['norm_w'], p['norm_b'])
    ace_out = ace_forward(p['ace'], xn.reshape(B, H, W, D, C), heads)
    attn = x_tok + p['gamma'] * ace_out
    attn_skip = attn.reshape(B, H, W, D, C)
    attn_c = unet_res_block(p['conv51'], attn_skip)
    return attn_skip + conv1x1_cl(attn_c, p['conv8_w'], shift=p['conv8_b'])


def encoder_forward(p, x_cl, heads):
    hidden = []
    x = x_cl
    for i in range(4):
        d = p['downs'][i]
        k = 4 if i == 0 else 2
        x = conv_patchify_cl(x, d['w'], None, k)
        x = group_norm_cl(x, d['gn_groups'], d['gn_w'], d['gn_b'])
        for blk in p['stages'][i]:
            x = transformer_block(blk, x, heads)
        if i == 3:
            B, H, W, D, C = x.shape
            x = x.reshape(B, H * W * D, C)
        hidden.append(x)
    return hidden


def up_block(p, inp, skip, heads):
    out = conv_transpose3d_cl(inp, p['transp_w'], None, p['k_up'])
    out = out + skip
    if p['conv_decoder']:
        out = unet_res_block(p['res'], out)
    else:
        for blk in p['blocks']:
            out = transformer_block(blk, out, heads)
    return out


def resaceunet2_forward(params, x_in):
    # x_in: (B, Cin, H, W, D) - PyTorch NCDHW
    x_cl = jnp.transpose(x_in.astype(jnp.float32), (0, 2, 3, 4, 1))
    heads = params['heads']
    hidden = encoder_forward(params['encoder'], x_cl, heads)
    conv_block = unet_res_block(params['encoder1'], x_cl)
    enc1, enc2, enc3, enc4 = hidden
    B = x_in.shape[0]
    f = params['feat_size']
    hs = params['hidden_size']
    dec4 = enc4.reshape(B, f, f, f, hs)
    dec3 = up_block(params['decoder5'], dec4, enc3, heads)
    dec2 = up_block(params['decoder4'], dec3, enc2, heads)
    dec1 = up_block(params['decoder3'], dec2, enc1, heads)
    out = up_block(params['decoder2'], dec1, conv_block, heads)
    logits_cl = conv1x1_cl(out, params['out1_w'], shift=params['out1_b'])
    return jnp.transpose(logits_cl, (0, 4, 1, 2, 3))


# ----------------------------------------------------------------------------
# Deterministic parameter initialization (synthetic; shapes follow __init__)
# ----------------------------------------------------------------------------
class PG:
    def __init__(self, seed):
        self.key = jax.random.PRNGKey(seed)

    def _take(self):
        self.key, k = jax.random.split(self.key)
        return k

    def normal(self, shape, std=0.02):
        return std * jax.random.normal(self._take(), shape, dtype=jnp.float32)

    def zeros(self, shape):
        return jnp.zeros(shape, jnp.float32)

    def ones(self, shape):
        return jnp.ones(shape, jnp.float32)


def init_bn(pg, c):
    return {'w': pg.ones((c,)), 'b': pg.zeros((c,)), 'rm': pg.zeros((c,)), 'rv': pg.ones((c,))}


def init_resblock(pg, cin, cout, norm):
    p = {'norm_name': norm,
         'conv1_w': pg.normal((cout, cin, 3, 3, 3)),
         'conv2_w': pg.normal((cout, cout, 3, 3, 3))}
    if norm == 'batch':
        p['norm1'] = init_bn(pg, cout)
        p['norm2'] = init_bn(pg, cout)
    if cin != cout:
        p['conv3_w'] = pg.normal((cout, cin, 1, 1, 1))
        if norm == 'batch':
            p['norm3'] = init_bn(pg, cout)
    return p


def init_ace(pg, input_size, hidden, proj, heads):
    return {
        'qkvv_w': pg.normal((4 * hidden, hidden)),
        'fc_w': pg.normal((16, 4 * heads)),
        'fc_b': pg.zeros((16,)),
        'dep_w': pg.normal((hidden, 16, 3, 3, 3)),
        'dep_b': pg.zeros((hidden,)),
        'E_w': pg.normal((proj, input_size)),
        'E_b': pg.zeros((proj,)),
        'temperature': pg.ones((heads, 1, 1)),
        'temperature2': pg.ones((heads, 1, 1)),
        'rate': jnp.asarray(1.0, jnp.float32),
        'rate2': jnp.asarray(1.0, jnp.float32),
        'out_proj_w': pg.normal((hidden // 2, hidden)),
        'out_proj_b': pg.zeros((hidden // 2,)),
        'out_proj2_w': pg.normal((hidden // 2, hidden)),
        'out_proj2_b': pg.zeros((hidden // 2,)),
    }


def init_tblock(pg, input_size, hidden, proj, heads):
    return {
        'norm_w': pg.ones((hidden,)),
        'norm_b': pg.zeros((hidden,)),
        'gamma': 1e-6 * pg.ones((hidden,)),
        'pos_embed': pg.zeros((1, input_size, hidden)),
        'ace': init_ace(pg, input_size, hidden, proj, heads),
        'conv51': init_resblock(pg, hidden, hidden, 'batch'),
        'conv8_w': pg.normal((hidden, hidden, 1, 1, 1)),
        'conv8_b': pg.zeros((hidden,)),
    }


def init_encoder(pg, in_channels, dims, input_sizes, proj_sizes, depths, heads):
    p = {'downs': [], 'stages': []}
    p['downs'].append({'w': pg.normal((dims[0], in_channels, 4, 4, 4)),
                       'gn_groups': in_channels,
                       'gn_w': pg.ones((dims[0],)), 'gn_b': pg.zeros((dims[0],))})
    for i in range(3):
        p['downs'].append({'w': pg.normal((dims[i + 1], dims[i], 2, 2, 2)),
                           'gn_groups': dims[i],
                           'gn_w': pg.ones((dims[i + 1],)), 'gn_b': pg.zeros((dims[i + 1],))})
    for i in range(4):
        p['stages'].append([init_tblock(pg, input_sizes[i], dims[i], proj_sizes[i], heads)
                            for _ in range(depths[i])])
    return p


def init_upblock(pg, cin, cout, k_up, out_size, proj, heads, depth=3,
                 conv_decoder=False, norm_name='instance'):
    p = {'transp_w': pg.normal((cin, cout, k_up, k_up, k_up)),
         'k_up': k_up, 'conv_decoder': conv_decoder}
    if conv_decoder:
        p['res'] = init_resblock(pg, cout, cout, norm_name)
    else:
        p['blocks'] = [init_tblock(pg, out_size, cout, proj, heads) for _ in range(depth)]
    return p


def init_model(seed, in_channels, out_channels, img_size, feature_size=16,
               hidden_size=256, heads=4, depths=(1, 1, 1, 1), dims=(32, 64, 128, 256)):
    assert feature_size * 16 == hidden_size
    pg = PG(seed)
    input_sizes = [(img_size // 4) ** 3, (img_size // 8) ** 3,
                   (img_size // 16) ** 3, (img_size // 32) ** 3]
    proj_sizes = [64, 64, 64, 32]
    return {
        'encoder': init_encoder(pg, in_channels, dims, input_sizes, proj_sizes, depths, heads),
        'encoder1': init_resblock(pg, in_channels, feature_size, 'instance'),
        'decoder5': init_upblock(pg, feature_size * 16, feature_size * 8, 2,
                                 (img_size // 16) ** 3, 64, heads),
        'decoder4': init_upblock(pg, feature_size * 8, feature_size * 4, 2,
                                 (img_size // 8) ** 3, 64, heads),
        'decoder3': init_upblock(pg, feature_size * 4, feature_size * 2, 2,
                                 (img_size // 4) ** 3, 64, heads),
        'decoder2': init_upblock(pg, feature_size * 2, feature_size, 4,
                                 img_size ** 3, 64, heads, conv_decoder=True),
        'out1_w': pg.normal((out_channels, feature_size, 1, 1, 1)),
        'out1_b': pg.zeros((out_channels,)),
        'hidden_size': hidden_size,
        'feat_size': img_size // 32,
        'heads': heads,
    }


# ----------------------------------------------------------------------------
if __name__ == "__main__":
    B, CIN, COUT, IMG = 1, 1, 2, 32   # smallest img_size compatible with the 32x downsampling
    params = init_model(seed=0, in_channels=CIN, out_channels=COUT, img_size=IMG,
                        feature_size=16, hidden_size=256, heads=4, depths=(1, 1, 1, 1))
    x = jax.random.normal(jax.random.PRNGKey(0), (B, CIN, IMG, IMG, IMG), dtype=jnp.float32)

    logits = resaceunet2_forward(params, x)
    logits = jax.block_until_ready(logits)

    assert logits.shape == (B, COUT, IMG, IMG, IMG), logits.shape
    assert bool(jnp.all(jnp.isfinite(logits)))
    print("KERNEL_OK")
</pallas_src>

<mosaic_0001>
module attributes {stable_mosaic.version = 11 : i64} {
  func.func @_bmm_kernel_1k(%arg0: i32, %arg1: i32, %arg2: i32, %arg3: memref<1x512x64xbf16, #tpu.memory_space<vmem>>, %arg4: memref<1x64x32xbf16, #tpu.memory_space<vmem>>, %arg5: memref<1x1x32xf32, #tpu.memory_space<vmem>>, %arg6: memref<1x1x32xf32, #tpu.memory_space<vmem>>, %arg7: memref<1x512x32xf32, #tpu.memory_space<vmem>>) attributes {dimension_semantics = [#tpu.dimension_semantics<parallel>, #tpu.dimension_semantics<parallel>, #tpu.dimension_semantics<parallel>], iteration_bounds = array<i64: 1, 1, 1>, scalar_prefetch = 0 : i64, scratch_operands = 0 : i64, tpu.core_type = #tpu.core_type<tc>, window_params = [{transform_indices = @transform_0, window_bounds = array<i64: 1, 512, 64>}, {transform_indices = @transform_1, window_bounds = array<i64: 1, 64, 32>}, {transform_indices = @transform_2, window_bounds = array<i64: 1, 1, 32>}, {transform_indices = @transform_3, window_bounds = array<i64: 1, 1, 32>}, {transform_indices = @transform_4, window_bounds = array<i64: 1, 512, 32>}]} {
    %c0 = arith.constant 0 : index
    %c0_0 = arith.constant 0 : index
    %c0_1 = arith.constant 0 : index
    %0 = vector.load %arg3[%c0, %c0_0, %c0_1] : memref<1x512x64xbf16, #tpu.memory_space<vmem>>, vector<1x512x64xbf16>
    %1 = vector.shape_cast %0 : vector<1x512x64xbf16> to vector<512x64xbf16>
    %c0_2 = arith.constant 0 : index
    %c0_3 = arith.constant 0 : index
    %c0_4 = arith.constant 0 : index
    %2 = vector.load %arg4[%c0_2, %c0_3, %c0_4] : memref<1x64x32xbf16, #tpu.memory_space<vmem>>, vector<1x64x32xbf16>
    %3 = vector.shape_cast %2 : vector<1x64x32xbf16> to vector<64x32xbf16>
    %cst = arith.constant dense<0.000000e+00> : vector<512x32xf32>
    %4 = tpu.matmul %1, %3, %cst {dimension_numbers = #tpu.dot_dimension_numbers<[1], [0], [0], [1], [0, 0, 1, 1], [], []>} : vector<512x64xbf16>, vector<64x32xbf16>, vector<512x32xf32> -> vector<512x32xf32>
    %c0_5 = arith.constant 0 : index
    %c0_6 = arith.constant 0 : index
    %c0_7 = arith.constant 0 : index
    %5 = vector.load %arg5[%c0_5, %c0_6, %c0_7] : memref<1x1x32xf32, #tpu.memory_space<vmem>>, vector<1x1x32xf32>
    %6 = vector.shape_cast %5 : vector<1x1x32xf32> to vector<1x32xf32>
    %7 = vector.broadcast %6 : vector<1x32xf32> to vector<512x32xf32>
    %8 = arith.mulf %4, %7 : vector<512x32xf32>
    %c0_8 = arith.constant 0 : index
    %c0_9 = arith.constant 0 : index
    %c0_10 = arith.constant 0 : index
    %9 = vector.load %arg6[%c0_8, %c0_9, %c0_10] : memref<1x1x32xf32, #tpu.memory_space<vmem>>, vector<1x1x32xf32>
    %10 = vector.shape_cast %9 : vector<1x1x32xf32> to vector<1x32xf32>
    %11 = vector.broadcast %10 : vector<1x32xf32> to vector<512x32xf32>
    %12 = arith.addf %8, %11 : vector<512x32xf32>
    %c0_11 = arith.constant 0 : index
    %c0_12 = arith.constant 0 : index
    %c0_13 = arith.constant 0 : index
    %13 = vector.load %arg7[%c0_11, %c0_12, %c0_13] : memref<1x512x32xf32, #tpu.memory_space<vmem>>, vector<1x512x32xf32>
    %14 = vector.shape_cast %13 : vector<1x512x32xf32> to vector<512x32xf32>
    %15 = vector.shape_cast %12 : vector<512x32xf32> to vector<1x512x32xf32>
    tpu.vector_store %arg7[%c0_11, %c0_12, %c0_13], %15 {strides = array<i32>} : memref<1x512x32xf32, #tpu.memory_space<vmem>>, vector<1x512x32xf32>,
    return
  }
  func.func @transform_0(%arg0: i32, %arg1: i32, %arg2: i32) -> (i32, i32, i32) {
    %c0_i32 = arith.constant 0 : i32
    %c0_i32_0 = arith.constant 0 : i32
    return %arg0, %arg1, %c0_i32 : i32, i32, i32
  }
  func.func @transform_1(%arg0: i32, %arg1: i32, %arg2: i32) -> (i32, i32, i32) {
    %c0_i32 = arith.constant 0 : i32
    %c0_i32_0 = arith.constant 0 : i32
    return %arg0, %c0_i32, %arg2 : i32, i32, i32
  }
  func.func @transform_2(%arg0: i32, %arg1: i32, %arg2: i32) -> (i32, i32, i32) {
    %c0_i32 = arith.constant 0 : i32
    %c0_i32_0 = arith.constant 0 : i32
    return %arg0, %c0_i32, %arg2 : i32, i32, i32
  }
  func.func @transform_3(%arg0: i32, %arg1: i32, %arg2: i32) -> (i32, i32, i32) {
    %c0_i32 = arith.constant 0 : i32
    %c0_i32_0 = arith.constant 0 : i32
    return %arg0, %c0_i32, %arg2 : i32, i32, i32
  }
  func.func @transform_4(%arg0: i32, %arg1: i32, %arg2: i32) -> (i32, i32, i32) {
    %c0_i32 = arith.constant 0 : i32
    return %arg0, %arg1, %arg2 : i32, i32, i32
  }
}

</mosaic_0001>

<bundles_post_ra>
// kernel: _bmm_pallas.1
= control target key start
LH: loop header
LB: loop body
LE: loop exit
PB: predicated region body
PF: predicated region fallthrough
CT: control target
= control target key end

     0   :  { %vm274_vm0 = vcmask 523264   ;;  %vm676_vm1 = vcmask 261120   ;;  %s1530_s1 = inlined_call_operand.vmem [shape: bf16[1,64,32], index: 1, kind: input, shape index: {}]   ;;  %s1531_s2 = inlined_call_operand.vmem [shape: f32[1,1,32], index: 2, kind: input, shape index: {}]   ;;  %s1532_s3 = inlined_call_operand.vmem [shape: f32[1,1,32], index: 3, kind: input, shape index: {}]   ;;  %s1533_s0 = inlined_call_operand.vmem [shape: bf16[1,512,64], index: 0, kind: input, shape index: {}]   ;;  %s1534_s4 = inlined_call_operand.vmem [shape: f32[1,512,32], index: 4, kind: output, shape index: {}]  }
   0x1   :  { %v956_v0 = vld [vmem:[%s1530_s1 + $0x18] sm:$0xff]  ;;  %v955_v1 = vld [vmem:[%s1530_s1 + $0x10] sm:$0xff]  ;;  %v954_v2 = vld [vmem:[%s1530_s1 + $0x8] sm:$0xff] }
   0x2   :  { %375 = vmatpush.bf16.msra.mxu0 %v956_v0  ;;  %957 = vmatpush.bf16.msra.mxu1 %v956_v0  ;;  %v953_v3 = vld [vmem:[%s1530_s1] sm:$0xff]  ;;  %v922_v8 = vld [vmem:[%s1533_s0 + $0x8] sm:$0xff]  ;;  %v923_v12 = vld [vmem:[%s1533_s0 + $0x10] sm:$0xff] }
   0x3   :  { %958 = vmatpush.bf16.msra.mxu2 %v956_v0  ;;  %959 = vmatpush.bf16.msra.mxu3 %v956_v0  ;;  %v921_v4 = vld [vmem:[%s1533_s0] sm:$0xff]  ;;  %v930_v9 = vld [vmem:[%s1533_s0 + $0x48] sm:$0xff]  ;;  %v931_v13 = vld [vmem:[%s1533_s0 + $0x50] sm:$0xff] }
   0x4   :  { %v929_v5 = vld [vmem:[%s1533_s0 + $0x40] sm:$0xff]  ;;  %v938_v10 = vld [vmem:[%s1533_s0 + $0x88] sm:$0xff]  ;;  %v939_v14 = vld [vmem:[%s1533_s0 + $0x90] sm:$0xff] }
   0x5   :  { %v937_v6 = vld [vmem:[%s1533_s0 + $0x80] sm:$0xff]  ;;  %v946_v11 = vld [vmem:[%s1533_s0 + $0xc8] sm:$0xff]  ;;  %v947_v15 = vld [vmem:[%s1533_s0 + $0xd0] sm:$0xff] }
   0x6   :  { %376 = vmatpush.bf16.msra.mxu0 %v955_v1  ;;  %960 = vmatpush.bf16.msra.mxu1 %v955_v1  ;;  %v945_v7 = vld [vmem:[%s1533_s0 + $0xc0] sm:$0xff]  ;;  %v924_v16 = vld [vmem:[%s1533_s0 + $0x18] sm:$0xff]  ;;  %v926_v24 = vld [vmem:[%s1533_s0 + $0x28] sm:$0xff] }
   0x7   :  { %961 = vmatpush.bf16.msra.mxu2 %v955_v1  ;;  %962 = vmatpush.bf16.msra.mxu3 %v955_v1  ;;  %v932_v17 = vld [vmem:[%s1533_s0 + $0x58] sm:$0xff]  ;;  %v925_v20 = vld [vmem:[%s1533_s0 + $0x20] sm:$0xff]  ;;  %v934_v25 = vld [vmem:[%s1533_s0 + $0x68] sm:$0xff] }
   0x8   :  { %v940_v18 = vld [vmem:[%s1533_s0 + $0x98] sm:$0xff]  ;;  %v933_v21 = vld [vmem:[%s1533_s0 + $0x60] sm:$0xff]  ;;  %v942_v26 = vld [vmem:[%s1533_s0 + $0xa8] sm:$0xff] }
   0x9   :  { %v948_v19 = vld [vmem:[%s1533_s0 + $0xd8] sm:$0xff]  ;;  %v941_v22 = vld [vmem:[%s1533_s0 + $0xa0] sm:$0xff]  ;;  %v950_v27 = vld [vmem:[%s1533_s0 + $0xe8] sm:$0xff] }
   0xa   :  { %377 = vmatpush.bf16.msra.mxu0 %v954_v2  ;;  %963 = vmatpush.bf16.msra.mxu1 %v954_v2  ;;  %v949_v23 = vld [vmem:[%s1533_s0 + $0xe0] sm:$0xff]  ;;  %v927_v28 = vld [vmem:[%s1533_s0 + $0x30] sm:$0xff]  ;;  %v928_v32 = vld [vmem:[%s1533_s0 + $0x38] sm:$0xff] }
   0xb   :  { %964 = vmatpush.bf16.msra.mxu2 %v954_v2  ;;  %965 = vmatpush.bf16.msra.mxu3 %v954_v2  ;;  %v935_v29 = vld [vmem:[%s1533_s0 + $0x70] sm:$0xff]  ;;  %v936_v33 = vld [vmem:[%s1533_s0 + $0x78] sm:$0xff]  ;;  %v1139_v36 = vld [vmem:[%s1531_s2] ss:$0 sm:$0xff] }
   0xc   :  { %v943_v30 = vld [vmem:[%s1533_s0 + $0xb0] sm:$0xff]  ;;  %v944_v34 = vld [vmem:[%s1533_s0 + $0xb8] sm:$0xff]  ;;  %v1144_v37 = vld [vmem:[%s1532_s3] ss:$0 sm:$0xff] }
   0xd   :  { %v951_v31 = vld [vmem:[%s1533_s0 + $0xf0] sm:$0xff]  ;;  %v952_v35 = vld [vmem:[%s1533_s0 + $0xf8] sm:$0xff] }
   0xe   :  { %378 = vmatpush.bf16.msra.mxu0 %v953_v3  ;;  %966 = vmatpush.bf16.msra.mxu1 %v953_v3 }
   0xf   :  { %967 = vmatpush.bf16.msra.mxu2 %v953_v3  ;;  %968 = vmatpush.bf16.msra.mxu3 %v953_v3 }
  0x11   :  { %889 = vmatmul.msk.bf16.vlgmr.msra.gmra.mxu0 %vm274_vm0, %v921_v4  ;;  %897 = vmatmul.msk.bf16.vlgmr.msra.gmra.mxu1 %vm274_vm0, %v929_v5 }
  0x12   :  { %905 = vmatmul.msk.bf16.vlgmr.msra.gmra.mxu2 %vm274_vm0, %v937_v6  ;;  %913 = vmatmul.msk.bf16.vlgmr.msra.gmra.mxu3 %vm274_vm0, %v945_v7 }
  0x21   :  { %890 = vmatmul.msk.bf16.gmra.mxu0 %vm274_vm0, %v922_v8  ;;  %898 = vmatmul.msk.bf16.gmra.mxu1 %vm274_vm0, %v930_v9 }
  0x22   :  { %906 = vmatmul.msk.bf16.gmra.mxu2 %vm274_vm0, %v938_v10  ;;  %914 = vmatmul.msk.bf16.gmra.mxu3 %vm274_vm0, %v946_v11 }
  0x31   :  { %891 = vmatmul.msk.bf16.gmra.mxu0 %vm274_vm0, %v923_v12  ;;  %899 = vmatmul.msk.bf16.gmra.mxu1 %vm274_vm0, %v931_v13 }
  0x32   :  { %907 = vmatmul.msk.bf16.gmra.mxu2 %vm274_vm0, %v939_v14  ;;  %915 = vmatmul.msk.bf16.gmra.mxu3 %vm274_vm0, %v947_v15 }
  0x41   :  { %892 = vmatmul.msk.bf16.gmra.mxu0 %vm274_vm0, %v924_v16  ;;  %900 = vmatmul.msk.bf16.gmra.mxu1 %vm274_vm0, %v932_v17 }
  0x42   :  { %908 = vmatmul.msk.bf16.gmra.mxu2 %vm274_vm0, %v940_v18  ;;  %916 = vmatmul.msk.bf16.gmra.mxu3 %vm274_vm0, %v948_v19 }
  0x51   :  { %893 = vmatmul.msk.bf16.gmra.mxu0 %vm274_vm0, %v925_v20  ;;  %901 = vmatmul.msk.bf16.gmra.mxu1 %vm274_vm0, %v933_v21 }
  0x52   :  { %909 = vmatmul.msk.bf16.gmra.mxu2 %vm274_vm0, %v941_v22  ;;  %917 = vmatmul.msk.bf16.gmra.mxu3 %vm274_vm0, %v949_v23 }
  0x61   :  { %894 = vmatmul.msk.bf16.gmra.mxu0 %vm274_vm0, %v926_v24  ;;  %902 = vmatmul.msk.bf16.gmra.mxu1 %vm274_vm0, %v934_v25 }
  0x62   :  { %910 = vmatmul.msk.bf16.gmra.mxu2 %vm274_vm0, %v942_v26  ;;  %918 = vmatmul.msk.bf16.gmra.mxu3 %vm274_vm0, %v950_v27 }
  0x71   :  { %895 = vmatmul.msk.bf16.gmra.mxu0 %vm274_vm0, %v927_v28  ;;  %903 = vmatmul.msk.bf16.gmra.mxu1 %vm274_vm0, %v935_v29 }
  0x72   :  { %911 = vmatmul.msk.bf16.gmra.mxu2 %vm274_vm0, %v943_v30  ;;  %919 = vmatmul.msk.bf16.gmra.mxu3 %vm274_vm0, %v951_v31 }
  0x81   :  { %896 = vmatmul.msk.bf16.gmra.mxu0 %vm274_vm0, %v928_v32  ;;  %904 = vmatmul.msk.bf16.gmra.mxu1 %vm274_vm0, %v936_v33 }
  0x82   :  { %912 = vmatmul.msk.bf16.gmra.mxu2 %vm274_vm0, %v944_v34  ;;  %920 = vmatmul.msk.bf16.gmra.mxu3 %vm274_vm0, %v952_v35 }
  0x8e   :  { %v380_v38 = vpop.f32.mrf.mxu0  ;;  %v420_v39 = vpop.f32.mrf.mxu1 }
  0x8f   :  { %v544_v40 = vmul.f32 %v1139_v36, %v380_v38  ;;  %v560_v41 = vmul.f32 %v1139_v36, %v420_v39 }
  0x91   :  { %v612_v42 = vadd.f32 %v1144_v37, %v544_v40  ;;  %v628_v43 = vadd.f32 %v1144_v37, %v560_v41 }
  0x93   :  { %677 = vst.msk [vmem:[%s1534_s4] sm:$0xff] %vm676_vm1, %v612_v42 }
  0x94   :  { %693 = vst.msk [vmem:[%s1534_s4 + $0x80] sm:$0xff] %vm676_vm1, %v628_v43 }
  0x95   :  { %v460_v44 = vpop.f32.mrf.mxu2  ;;  %v500_v45 = vpop.f32.mrf.mxu3 }
  0x96   :  { %v576_v46 = vmul.f32 %v1139_v36, %v460_v44  ;;  %v592_v47 = vmul.f32 %v1139_v36, %v500_v45  ;;  %v382_v48 = vpop.f32.mrf.mxu0  ;;  %v422_v49 = vpop.f32.mrf.mxu1 }
  0x97   :  { %v545_v50 = vmul.f32 %v1139_v36, %v382_v48  ;;  %v561_v51 = vmul.f32 %v1139_v36, %v422_v49 }
  0x98   :  { %v644_v52 = vadd.f32 %v1144_v37, %v576_v46  ;;  %v660_v53 = vadd.f32 %v1144_v37, %v592_v47 }
  0x99   :  { %v613_v54 = vadd.f32 %v1144_v37, %v545_v50  ;;  %v629_v55 = vadd.f32 %v1144_v37, %v561_v51 }
  0x9a   :  { %709 = vst.msk [vmem:[%s1534_s4 + $0x100] sm:$0xff] %vm676_vm1, %v644_v52 }
  0x9b   :  { %725 = vst.msk [vmem:[%s1534_s4 + $0x180] sm:$0xff] %vm676_vm1, %v660_v53 }
  0x9c   :  { %678 = vst.msk [vmem:[%s1534_s4 + $0x8] sm:$0xff] %vm676_vm1, %v613_v54 }
  0x9d   :  { %694 = vst.msk [vmem:[%s1534_s4 + $0x88] sm:$0xff] %vm676_vm1, %v629_v55  ;;  %v462_v56 = vpop.f32.mrf.mxu2  ;;  %v502_v57 = vpop.f32.mrf.mxu3 }
  0x9e   :  { %v577_v58 = vmul.f32 %v1139_v36, %v462_v56  ;;  %v593_v59 = vmul.f32 %v1139_v36, %v502_v57  ;;  %v385_v60 = vpop.f32.mrf.mxu0  ;;  %v425_v61 = vpop.f32.mrf.mxu1 }
  0x9f   :  { %v546_v62 = vmul.f32 %v1139_v36, %v385_v60  ;;  %v562_v63 = vmul.f32 %v1139_v36, %v425_v61 }
  0xa0   :  { %v645_v0 = vadd.f32 %v1144_v37, %v577_v58  ;;  %v661_v1 = vadd.f32 %v1144_v37, %v593_v59 }
  0xa1   :  { %v614_v2 = vadd.f32 %v1144_v37, %v546_v62  ;;  %v630_v3 = vadd.f32 %v1144_v37, %v562_v63 }
  0xa2   :  { %710 = vst.msk [vmem:[%s1534_s4 + $0x108] sm:$0xff] %vm676_vm1, %v645_v0 }
  0xa3   :  { %726 = vst.msk [vmem:[%s1534_s4 + $0x188] sm:$0xff] %vm676_vm1, %v661_v1 }
  0xa4   :  { %679 = vst.msk [vmem:[%s1534_s4 + $0x10] sm:$0xff] %vm676_vm1, %v614_v2 }
  0xa5   :  { %695 = vst.msk [vmem:[%s1534_s4 + $0x90] sm:$0xff] %vm676_vm1, %v630_v3  ;;  %v465_v4 = vpop.f32.mrf.mxu2  ;;  %v505_v5 = vpop.f32.mrf.mxu3 }
  0xa6   :  { %v578_v6 = vmul.f32 %v1139_v36, %v465_v4  ;;  %v594_v7 = vmul.f32 %v1139_v36, %v505_v5  ;;  %v387_v8 = vpop.f32.mrf.mxu0  ;;  %v427_v9 = vpop.f32.mrf.mxu1 }
  0xa7   :  { %v547_v10 = vmul.f32 %v1139_v36, %v387_v8  ;;  %v563_v11 = vmul.f32 %v1139_v36, %v427_v9 }
  0xa8   :  { %v646_v12 = vadd.f32 %v1144_v37, %v578_v6  ;;  %v662_v13 = vadd.f32 %v1144_v37, %v594_v7 }
  0xa9   :  { %v615_v14 = vadd.f32 %v1144_v37, %v547_v10  ;;  %v631_v15 = vadd.f32 %v1144_v37, %v563_v11 }
  0xaa   :  { %711 = vst.msk [vmem:[%s1534_s4 + $0x110] sm:$0xff] %vm676_vm1, %v646_v12 }
  0xab   :  { %727 = vst.msk [vmem:[%s1534_s4 + $0x190] sm:$0xff] %vm676_vm1, %v662_v13 }
  0xac   :  { %680 = vst.msk [vmem:[%s1534_s4 + $0x18] sm:$0xff] %vm676_vm1, %v615_v14 }
  0xad   :  { %696 = vst.msk [vmem:[%s1534_s4 + $0x98] sm:$0xff] %vm676_vm1, %v631_v15  ;;  %v467_v16 = vpop.f32.mrf.mxu2  ;;  %v507_v17 = vpop.f32.mrf.mxu3 }
  0xae   :  { %v579_v18 = vmul.f32 %v1139_v36, %v467_v16  ;;  %v595_v19 = vmul.f32 %v1139_v36, %v507_v17  ;;  %v390_v20 = vpop.f32.mrf.mxu0  ;;  %v430_v21 = vpop.f32.mrf.mxu1 }
  0xaf   :  { %v548_v22 = vmul.f32 %v1139_v36, %v390_v20  ;;  %v564_v23 = vmul.f32 %v1139_v36, %v430_v21 }
  0xb0   :  { %v647_v24 = vadd.f32 %v1144_v37, %v579_v18  ;;  %v663_v25 = vadd.f32 %v1144_v37, %v595_v19 }
  0xb1   :  { %v616_v26 = vadd.f32 %v1144_v37, %v548_v22  ;;  %v632_v27 = vadd.f32 %v1144_v37, %v564_v23 }
  0xb2   :  { %712 = vst.msk [vmem:[%s1534_s4 + $0x118] sm:$0xff] %vm676_vm1, %v647_v24 }
  0xb3   :  { %728 = vst.msk [vmem:[%s1534_s4 + $0x198] sm:$0xff] %vm676_vm1, %v663_v25 }
  0xb4   :  { %681 = vst.msk [vmem:[%s1534_s4 + $0x20] sm:$0xff] %vm676_vm1, %v616_v26 }
  0xb5   :  { %697 = vst.msk [vmem:[%s1534_s4 + $0xa0] sm:$0xff] %vm676_vm1, %v632_v27  ;;  %v470_v28 = vpop.f32.mrf.mxu2  ;;  %v510_v29 = vpop.f32.mrf.mxu3 }
  0xb6   :  { %v580_v30 = vmul.f32 %v1139_v36, %v470_v28  ;;  %v596_v31 = vmul.f32 %v1139_v36, %v510_v29  ;;  %v392_v32 = vpop.f32.mrf.mxu0  ;;  %v432_v33 = vpop.f32.mrf.mxu1 }
  0xb7   :  { %v549_v34 = vmul.f32 %v1139_v36, %v392_v32  ;;  %v565_v35 = vmul.f32 %v1139_v36, %v432_v33 }
  0xb8   :  { %v648_v38 = vadd.f32 %v1144_v37, %v580_v30  ;;  %v664_v39 = vadd.f32 %v1144_v37, %v596_v31 }
  0xb9   :  { %v617_v40 = vadd.f32 %v1144_v37, %v549_v34  ;;  %v633_v41 = vadd.f32 %v1144_v37, %v565_v35 }
  0xba   :  { %713 = vst.msk [vmem:[%s1534_s4 + $0x120] sm:$0xff] %vm676_vm1, %v648_v38 }
  0xbb   :  { %729 = vst.msk [vmem:[%s1534_s4 + $0x1a0] sm:$0xff] %vm676_vm1, %v664_v39 }
  0xbc   :  { %682 = vst.msk [vmem:[%s1534_s4 + $0x28] sm:$0xff] %vm676_vm1, %v617_v40 }
  0xbd   :  { %698 = vst.msk [vmem:[%s1534_s4 + $0xa8] sm:$0xff] %vm676_vm1, %v633_v41  ;;  %v472_v42 = vpop.f32.mrf.mxu2  ;;  %v512_v43 = vpop.f32.mrf.mxu3 }
  0xbe   :  { %v581_v44 = vmul.f32 %v1139_v36, %v472_v42  ;;  %v597_v45 = vmul.f32 %v1139_v36, %v512_v43  ;;  %v395_v46 = vpop.f32.mrf.mxu0  ;;  %v435_v47 = vpop.f32.mrf.mxu1 }
  0xbf   :  { %v550_v48 = vmul.f32 %v1139_v36, %v395_v46  ;;  %v566_v49 = vmul.f32 %v1139_v36, %v435_v47 }
  0xc0   :  { %v649_v50 = vadd.f32 %v1144_v37, %v581_v44  ;;  %v665_v51 = vadd.f32 %v1144_v37, %v597_v45 }
  0xc1   :  { %v618_v52 = vadd.f32 %v1144_v37, %v550_v48  ;;  %v634_v53 = vadd.f32 %v1144_v37, %v566_v49 }
  0xc2   :  { %714 = vst.msk [vmem:[%s1534_s4 + $0x128] sm:$0xff] %vm676_vm1, %v649_v50 }
  0xc3   :  { %730 = vst.msk [vmem:[%s1534_s4 + $0x1a8] sm:$0xff] %vm676_vm1, %v665_v51 }
  0xc4   :  { %683 = vst.msk [vmem:[%s1534_s4 + $0x30] sm:$0xff] %vm676_vm1, %v618_v52 }
  0xc5   :  { %699 = vst.msk [vmem:[%s1534_s4 + $0xb0] sm:$0xff] %vm676_vm1, %v634_v53  ;;  %v475_v54 = vpop.f32.mrf.mxu2  ;;  %v515_v55 = vpop.f32.mrf.mxu3 }
  0xc6   :  { %v582_v56 = vmul.f32 %v1139_v36, %v475_v54  ;;  %v598_v57 = vmul.f32 %v1139_v36, %v515_v55  ;;  %v397_v58 = vpop.f32.mrf.mxu0  ;;  %v437_v59 = vpop.f32.mrf.mxu1 }
  0xc7   :  { %v551_v60 = vmul.f32 %v1139_v36, %v397_v58  ;;  %v567_v61 = vmul.f32 %v1139_v36, %v437_v59 }
  0xc8   :  { %v650_v62 = vadd.f32 %v1144_v37, %v582_v56  ;;  %v666_v63 = vadd.f32 %v1144_v37, %v598_v57 }
  0xc9   :  { %v619_v0 = vadd.f32 %v1144_v37, %v551_v60  ;;  %v635_v1 = vadd.f32 %v1144_v37, %v567_v61 }
  0xca   :  { %715 = vst.msk [vmem:[%s1534_s4 + $0x130] sm:$0xff] %vm676_vm1, %v650_v62 }
  0xcb   :  { %731 = vst.msk [vmem:[%s1534_s4 + $0x1b0] sm:$0xff] %vm676_vm1, %v666_v63 }
  0xcc   :  { %684 = vst.msk [vmem:[%s1534_s4 + $0x38] sm:$0xff] %vm676_vm1, %v619_v0 }
  0xcd   :  { %700 = vst.msk [vmem:[%s1534_s4 + $0xb8] sm:$0xff] %vm676_vm1, %v635_v1  ;;  %v477_v2 = vpop.f32.mrf.mxu2  ;;  %v517_v3 = vpop.f32.mrf.mxu3 }
  0xce   :  { %v583_v4 = vmul.f32 %v1139_v36, %v477_v2  ;;  %v599_v5 = vmul.f32 %v1139_v36, %v517_v3  ;;  %v400_v6 = vpop.f32.mrf.mxu0  ;;  %v440_v7 = vpop.f32.mrf.mxu1 }
  0xcf   :  { %v552_v8 = vmul.f32 %v1139_v36, %v400_v6  ;;  %v568_v9 = vmul.f32 %v1139_v36, %v440_v7 }
  0xd0   :  { %v651_v10 = vadd.f32 %v1144_v37, %v583_v4  ;;  %v667_v11 = vadd.f32 %v1144_v37, %v599_v5 }
  0xd1   :  { %v620_v12 = vadd.f32 %v1144_v37, %v552_v8  ;;  %v636_v13 = vadd.f32 %v1144_v37, %v568_v9 }
  0xd2   :  { %716 = vst.msk [vmem:[%s1534_s4 + $0x138] sm:$0xff] %vm676_vm1, %v651_v10 }
  0xd3   :  { %732 = vst.msk [vmem:[%s1534_s4 + $0x1b8] sm:$0xff] %vm676_vm1, %v667_v11 }
  0xd4   :  { %685 = vst.msk [vmem:[%s1534_s4 + $0x40] sm:$0xff] %vm676_vm1, %v620_v12 }
  0xd5   :  { %701 = vst.msk [vmem:[%s1534_s4 + $0xc0] sm:$0xff] %vm676_vm1, %v636_v13  ;;  %v480_v14 = vpop.f32.mrf.mxu2  ;;  %v520_v15 = vpop.f32.mrf.mxu3 }
  0xd6   :  { %v584_v16 = vmul.f32 %v1139_v36, %v480_v14  ;;  %v600_v17 = vmul.f32 %v1139_v36, %v520_v15  ;;  %v402_v18 = vpop.f32.mrf.mxu0  ;;  %v442_v19 = vpop.f32.mrf.mxu1 }
  0xd7   :  { %v553_v20 = vmul.f32 %v1139_v36, %v402_v18  ;;  %v569_v21 = vmul.f32 %v1139_v36, %v442_v19 }
  0xd8   :  { %v652_v22 = vadd.f32 %v1144_v37, %v584_v16  ;;  %v668_v23 = vadd.f32 %v1144_v37, %v600_v17 }
  0xd9   :  { %v621_v24 = vadd.f32 %v1144_v37, %v553_v20  ;;  %v637_v25 = vadd.f32 %v1144_v37, %v569_v21 }
  0xda   :  { %717 = vst.msk [vmem:[%s1534_s4 + $0x140] sm:$0xff] %vm676_vm1, %v652_v22 }
  0xdb   :  { %733 = vst.msk [vmem:[%s1534_s4 + $0x1c0] sm:$0xff] %vm676_vm1, %v668_v23 }
  0xdc   :  { %686 = vst.msk [vmem:[%s1534_s4 + $0x48] sm:$0xff] %vm676_vm1, %v621_v24 }
  0xdd   :  { %702 = vst.msk [vmem:[%s1534_s4 + $0xc8] sm:$0xff] %vm676_vm1, %v637_v25  ;;  %v482_v26 = vpop.f32.mrf.mxu2  ;;  %v522_v27 = vpop.f32.mrf.mxu3 }
  0xde   :  { %v585_v28 = vmul.f32 %v1139_v36, %v482_v26  ;;  %v601_v29 = vmul.f32 %v1139_v36, %v522_v27  ;;  %v405_v30 = vpop.f32.mrf.mxu0  ;;  %v445_v31 = vpop.f32.mrf.mxu1 }
  0xdf   :  { %v554_v32 = vmul.f32 %v1139_v36, %v405_v30  ;;  %v570_v33 = vmul.f32 %v1139_v36, %v445_v31 }
  0xe0   :  { %v653_v34 = vadd.f32 %v1144_v37, %v585_v28  ;;  %v669_v35 = vadd.f32 %v1144_v37, %v601_v29 }
  0xe1   :  { %v622_v38 = vadd.f32 %v1144_v37, %v554_v32  ;;  %v638_v39 = vadd.f32 %v1144_v37, %v570_v33 }
  0xe2   :  { %718 = vst.msk [vmem:[%s1534_s4 + $0x148] sm:$0xff] %vm676_vm1, %v653_v34 }
  0xe3   :  { %734 = vst.msk [vmem:[%s1534_s4 + $0x1c8] sm:$0xff] %vm676_vm1, %v669_v35 }
  0xe4   :  { %687 = vst.msk [vmem:[%s1534_s4 + $0x50] sm:$0xff] %vm676_vm1, %v622_v38 }
  0xe5   :  { %703 = vst.msk [vmem:[%s1534_s4 + $0xd0] sm:$0xff] %vm676_vm1, %v638_v39  ;;  %v485_v40 = vpop.f32.mrf.mxu2  ;;  %v525_v41 = vpop.f32.mrf.mxu3 }
  0xe6   :  { %v586_v42 = vmul.f32 %v1139_v36, %v485_v40  ;;  %v602_v43 = vmul.f32 %v1139_v36, %v525_v41  ;;  %v407_v44 = vpop.f32.mrf.mxu0  ;;  %v447_v45 = vpop.f32.mrf.mxu1 }
  0xe7   :  { %v555_v46 = vmul.f32 %v1139_v36, %v407_v44  ;;  %v571_v47 = vmul.f32 %v1139_v36, %v447_v45 }
  0xe8   :  { %v654_v48 = vadd.f32 %v1144_v37, %v586_v42  ;;  %v670_v49 = vadd.f32 %v1144_v37, %v602_v43 }
  0xe9   :  { %v623_v50 = vadd.f32 %v1144_v37, %v555_v46  ;;  %v639_v51 = vadd.f32 %v1144_v37, %v571_v47 }
  0xea   :  { %719 = vst.msk [vmem:[%s1534_s4 + $0x150] sm:$0xff] %vm676_vm1, %v654_v48 }
  0xeb   :  { %735 = vst.msk [vmem:[%s1534_s4 + $0x1d0] sm:$0xff] %vm676_vm1, %v670_v49 }
  0xec   :  { %688 = vst.msk [vmem:[%s1534_s4 + $0x58] sm:$0xff] %vm676_vm1, %v623_v50 }
  0xed   :  { %704 = vst.msk [vmem:[%s1534_s4 + $0xd8] sm:$0xff] %vm676_vm1, %v639_v51  ;;  %v487_v52 = vpop.f32.mrf.mxu2  ;;  %v527_v53 = vpop.f32.mrf.mxu3 }
  0xee   :  { %v587_v54 = vmul.f32 %v1139_v36, %v487_v52  ;;  %v603_v55 = vmul.f32 %v1139_v36, %v527_v53  ;;  %v410_v56 = vpop.f32.mrf.mxu0  ;;  %v450_v57 = vpop.f32.mrf.mxu1 }
  0xef   :  { %v556_v58 = vmul.f32 %v1139_v36, %v410_v56  ;;  %v572_v59 = vmul.f32 %v1139_v36, %v450_v57 }
  0xf0   :  { %v655_v60 = vadd.f32 %v1144_v37, %v587_v54  ;;  %v671_v61 = vadd.f32 %v1144_v37, %v603_v55 }
  0xf1   :  { %v624_v62 = vadd.f32 %v1144_v37, %v556_v58  ;;  %v640_v63 = vadd.f32 %v1144_v37, %v572_v59 }
  0xf2   :  { %720 = vst.msk [vmem:[%s1534_s4 + $0x158] sm:$0xff] %vm676_vm1, %v655_v60 }
  0xf3   :  { %736 = vst.msk [vmem:[%s1534_s4 + $0x1d8] sm:$0xff] %vm676_vm1, %v671_v61 }
  0xf4   :  { %689 = vst.msk [vmem:[%s1534_s4 + $0x60] sm:$0xff] %vm676_vm1, %v624_v62 }
  0xf5   :  { %705 = vst.msk [vmem:[%s1534_s4 + $0xe0] sm:$0xff] %vm676_vm1, %v640_v63  ;;  %v490_v0 = vpop.f32.mrf.mxu2  ;;  %v530_v1 = vpop.f32.mrf.mxu3 }
  0xf6   :  { %v588_v2 = vmul.f32 %v1139_v36, %v490_v0  ;;  %v604_v3 = vmul.f32 %v1139_v36, %v530_v1  ;;  %v412_v4 = vpop.f32.mrf.mxu0  ;;  %v452_v5 = vpop.f32.mrf.mxu1 }
  0xf7   :  { %v557_v6 = vmul.f32 %v1139_v36, %v412_v4  ;;  %v573_v7 = vmul.f32 %v1139_v36, %v452_v5 }
  0xf8   :  { %v656_v8 = vadd.f32 %v1144_v37, %v588_v2  ;;  %v672_v9 = vadd.f32 %v1144_v37, %v604_v3 }
  0xf9   :  { %v625_v10 = vadd.f32 %v1144_v37, %v557_v6  ;;  %v641_v11 = vadd.f32 %v1144_v37, %v573_v7 }
  0xfa   :  { %721 = vst.msk [vmem:[%s1534_s4 + $0x160] sm:$0xff] %vm676_vm1, %v656_v8 }
  0xfb   :  { %737 = vst.msk [vmem:[%s1534_s4 + $0x1e0] sm:$0xff] %vm676_vm1, %v672_v9 }
  0xfc   :  { %690 = vst.msk [vmem:[%s1534_s4 + $0x68] sm:$0xff] %vm676_vm1, %v625_v10 }
  0xfd   :  { %706 = vst.msk [vmem:[%s1534_s4 + $0xe8] sm:$0xff] %vm676_vm1, %v641_v11  ;;  %v492_v12 = vpop.f32.mrf.mxu2  ;;  %v532_v13 = vpop.f32.mrf.mxu3 }
  0xfe   :  { %v589_v14 = vmul.f32 %v1139_v36, %v492_v12  ;;  %v605_v15 = vmul.f32 %v1139_v36, %v532_v13  ;;  %v415_v16 = vpop.f32.mrf.mxu0  ;;  %v455_v17 = vpop.f32.mrf.mxu1 }
  0xff   :  { %v558_v18 = vmul.f32 %v1139_v36, %v415_v16  ;;  %v574_v19 = vmul.f32 %v1139_v36, %v455_v17 }
 0x100   :  { %v657_v20 = vadd.f32 %v1144_v37, %v589_v14  ;;  %v673_v21 = vadd.f32 %v1144_v37, %v605_v15 }
 0x101   :  { %v626_v22 = vadd.f32 %v1144_v37, %v558_v18  ;;  %v642_v23 = vadd.f32 %v1144_v37, %v574_v19 }
 0x102   :  { %722 = vst.msk [vmem:[%s1534_s4 + $0x168] sm:$0xff] %vm676_vm1, %v657_v20 }
 0x103   :  { %738 = vst.msk [vmem:[%s1534_s4 + $0x1e8] sm:$0xff] %vm676_vm1, %v673_v21 }
 0x104   :  { %691 = vst.msk [vmem:[%s1534_s4 + $0x70] sm:$0xff] %vm676_vm1, %v626_v22 }
 0x105   :  { %707 = vst.msk [vmem:[%s1534_s4 + $0xf0] sm:$0xff] %vm676_vm1, %v642_v23  ;;  %v495_v24 = vpop.f32.mrf.mxu2  ;;  %v535_v25 = vpop.f32.mrf.mxu3 }
 0x106   :  { %v590_v26 = vmul.f32 %v1139_v36, %v495_v24  ;;  %v606_v27 = vmul.f32 %v1139_v36, %v535_v25  ;;  %v417_v28 = vpop.f32.mrf.mxu0  ;;  %v457_v29 = vpop.f32.mrf.mxu1 }
 0x107   :  { %v559_v30 = vmul.f32 %v1139_v36, %v417_v28  ;;  %v575_v31 = vmul.f32 %v1139_v36, %v457_v29 }
 0x108   :  { %v658_v32 = vadd.f32 %v1144_v37, %v590_v26  ;;  %v674_v33 = vadd.f32 %v1144_v37, %v606_v27 }
 0x109   :  { %v627_v34 = vadd.f32 %v1144_v37, %v559_v30  ;;  %v643_v35 = vadd.f32 %v1144_v37, %v575_v31 }
 0x10a   :  { %723 = vst.msk [vmem:[%s1534_s4 + $0x170] sm:$0xff] %vm676_vm1, %v658_v32 }
 0x10b   :  { %739 = vst.msk [vmem:[%s1534_s4 + $0x1f0] sm:$0xff] %vm676_vm1, %v674_v33 }
 0x10c   :  { %692 = vst.msk [vmem:[%s1534_s4 + $0x78] sm:$0xff] %vm676_vm1, %v627_v34 }
 0x10d   :  { %708 = vst.msk [vmem:[%s1534_s4 + $0xf8] sm:$0xff] %vm676_vm1, %v643_v35  ;;  %v497_v38 = vpop.f32.mrf.mxu2  ;;  %v537_v39 = vpop.f32.mrf.mxu3 }
 0x10e   :  { %v591_v40 = vmul.f32 %v1139_v36, %v497_v38  ;;  %v607_v41 = vmul.f32 %v1139_v36, %v537_v39 }
 0x110   :  { %v659_v42 = vadd.f32 %v1144_v37, %v591_v40  ;;  %v675_v43 = vadd.f32 %v1144_v37, %v607_v41 }
 0x112   :  { %724 = vst.msk [vmem:[%s1534_s4 + $0x178] sm:$0xff] %vm676_vm1, %v659_v42 }
 0x113   :  { %740 = vst.msk [vmem:[%s1534_s4 + $0x1f8] sm:$0xff] %vm676_vm1, %v675_v43 }

</bundles_post_ra>
